<compile_context>
chip_gen: v7x
topology: tpu7x:2x2x1
jax: 0.10.0
libtpu: 0.0.40
codegen_flags: <defaults>
</compile_context>

<pallas_src>
import functools

import jax
import jax.numpy as jnp
from jax import lax
from jax.experimental import pallas as pl
from jax.experimental.pallas import tpu as pltpu
import numpy as np

_NEG_INF = -1e30  # pad-column bias; exp(-1e30 - m) underflows cleanly to 0 in f32.

_VMEM = pl.BlockSpec(memory_space=pltpu.MemorySpace.VMEM)
_SMEM = pl.BlockSpec(memory_space=pltpu.MemorySpace.SMEM)


def _bigram_kernel(idx_ref, *rest, seq_len, compute_loss):
    """logits[i, :] = bigram_table[idx[i], :] + pos_logits[i % T, :].

    Refs (compute_loss=True):
      idx (BT,) i32 SMEM, tgt (BT,) i32 SMEM, pos_logits (T_max,Vp) f32 VMEM,
      bigram_table (Vp,Vp) f32 VMEM  ->  logits (BT,Vp) f32 VMEM, loss (1,1) f32 SMEM.
    Refs (compute_loss=False): idx, pos_logits, bigram_table -> logits.
    """
    if compute_loss:
        tgt_ref, pos_ref, big_ref, logits_ref, loss_ref = rest
    else:
        pos_ref, big_ref, logits_ref = rest
        tgt_ref = loss_ref = None

    BT, Vp = logits_ref.shape
    T = seq_len

    lane_iota = None
    picked_acc = None
    if compute_loss:
        lane_iota = lax.broadcasted_iota(jnp.int32, (1, Vp), 1)
        picked_acc = jnp.zeros((1, Vp), jnp.float32)

    # Statically-unrolled exact row gather (BT is tiny and static).
    for i in range(BT):
        t = i % T                                          # static position index
        tok_row = big_ref[pl.ds(idx_ref[i], 1), :]         # (1, Vp) dynamic gather
        row = tok_row + pos_ref[pl.ds(t, 1), :]            # fused pos logits + bias
        logits_ref[pl.ds(i, 1), :] = row                   # lane-dense, static row
        if compute_loss:
            # Accumulate the picked target logit as a masked vector; reduce once.
            picked_acc = picked_acc + jnp.where(lane_iota == tgt_ref[i], row, 0.0)

    # Cross-entropy (mean over B*T); compiled out entirely on the inference path.
    if compute_loss:
        logits = logits_ref[...]                           # (BT, Vp) vectorized pass
        m = jnp.max(logits, axis=-1, keepdims=True)        # pads (-1e30) never win
        lse = jnp.log(jnp.sum(jnp.exp(logits - m), axis=-1, keepdims=True)) + m
        picked_sum = jnp.sum(picked_acc)
        loss_ref[0, 0] = (jnp.sum(lse) - picked_sum) / jnp.float32(BT)


def _decode_kernel(idx_ref, pos_idx_ref, pos_ref, big_ref, logits_ref):
    """Last-position logits only: (B, Vp) = gather(bigram, last_tokens) + pos[t]."""
    B, _ = logits_ref.shape
    pos_row = pos_ref[pl.ds(pos_idx_ref[0], 1), :]         # (1, Vp) dynamic row
    for b in range(B):
        tok_row = big_ref[pl.ds(idx_ref[b], 1), :]
        logits_ref[pl.ds(b, 1), :] = tok_row + pos_row


def prepare_params(params):
    """One-time parameter prep: pad vocab to a multiple of 128 lanes and fuse matmuls.

    params: tok_table (V,E), pos_table (T_max,E), lm_head_w (V,E), lm_head_b (V,).
    """
    tok = params["tok_table"].astype(jnp.float32)          # (V, E)
    pos = params["pos_table"].astype(jnp.float32)          # (T_max, E)
    w = params["lm_head_w"].astype(jnp.float32)            # (V, E) PyTorch layout
    b = params["lm_head_b"].astype(jnp.float32)            # (V,)

    V, E = tok.shape
    T_max = pos.shape[0]
    Vp = ((V + 127) // 128) * 128                          # lane-dense padded vocab

    w_t = jnp.pad(w.T, ((0, 0), (0, Vp - V)))              # (E, Vp), pad cols = 0
    b_pad = jnp.concatenate(
        [b, jnp.full((Vp - V,), _NEG_INF, jnp.float32)])   # pad bias -> -inf-ish
    tok_pad = jnp.pad(tok, ((0, Vp - V), (0, 0)))          # (Vp, E), pad rows = 0

    return {
        "bigram_table": tok_pad @ w_t,                     # (Vp, Vp), no bias
        "pos_logits": pos @ w_t + b_pad[None, :],          # (T_max, Vp), bias + pads
        "vocab_size": V,                                   # static
        "vocab_padded": Vp,                                # static
        "block_size": T_max,                               # static
    }


def bigram_forward(prep, idx, targets=None, *, pad_vocab=False):
    """Forward pass matching the PyTorch module.

    targets given  -> (logits (B*T, V), scalar loss)
    targets = None -> (logits (B, T, V), None)
    pad_vocab=True returns padded (…, Vp) logits (pad cols = -1e30, softmax/argmax
    safe) and skips the non-lane-dense vocab slice for hot-path callers.
    """
    bigram = prep["bigram_table"]                          # (Vp, Vp)
    pos_logits = prep["pos_logits"]                        # (T_max, Vp)
    V, Vp = prep["vocab_size"], prep["vocab_padded"]

    B, T = idx.shape
    assert T <= prep["block_size"], (
        f"sequence length {T} exceeds prepared positional table {prep['block_size']}")
    BT = B * T
    idx_flat = idx.reshape(BT).astype(jnp.int32)

    if targets is None:
        kernel = functools.partial(_bigram_kernel, seq_len=T, compute_loss=False)
        logits_flat = pl.pallas_call(
            kernel,
            out_shape=jax.ShapeDtypeStruct((BT, Vp), jnp.float32),
            in_specs=[_SMEM, _VMEM, _VMEM],
            out_specs=_VMEM,
        )(idx_flat, pos_logits, bigram)
        if pad_vocab:
            return logits_flat.reshape(B, T, Vp), None
        return logits_flat[:, :V].reshape(B, T, V), None

    tgt_flat = targets.reshape(BT).astype(jnp.int32)
    kernel = functools.partial(_bigram_kernel, seq_len=T, compute_loss=True)
    logits_flat, loss2d = pl.pallas_call(
        kernel,
        out_shape=(
            jax.ShapeDtypeStruct((BT, Vp), jnp.float32),
            jax.ShapeDtypeStruct((1, 1), jnp.float32),     # scalar loss in SMEM
        ),
        in_specs=[_SMEM, _SMEM, _VMEM, _VMEM],
        out_specs=(_VMEM, _SMEM),
    )(idx_flat, tgt_flat, pos_logits, bigram)
    logits = logits_flat if pad_vocab else logits_flat[:, :V]
    return logits, loss2d[0, 0]


def bigram_last_logits(prep, last_tokens, pos_index):
    """Decode specialization: padded (B, Vp) next-token logits at `pos_index`.

    Pad columns sit at ~-1e30, so downstream softmax / argmax / sampling need no
    vocab slice.
    """
    B = last_tokens.shape[0]
    Vp = prep["vocab_padded"]
    pos_idx = jnp.asarray(pos_index, jnp.int32).reshape(1)
    return pl.pallas_call(
        _decode_kernel,
        out_shape=jax.ShapeDtypeStruct((B, Vp), jnp.float32),
        in_specs=[_SMEM, _SMEM, _VMEM, _VMEM],
        out_specs=_VMEM,
    )(last_tokens.reshape(B).astype(jnp.int32), pos_idx,
      prep["pos_logits"], prep["bigram_table"])


def _reference_forward(params, idx, targets=None):
    """Pure-JAX reference, faithful to the PyTorch module (unfused, unpadded)."""
    tok = params["tok_table"][idx]                         # (B, T, E)
    B, T = idx.shape
    pos = params["pos_table"][:T]                          # (T, E)
    x = tok + pos[None]
    logits = x @ params["lm_head_w"].T + params["lm_head_b"]
    if targets is None:
        return logits, None
    V = logits.shape[-1]
    lf = logits.reshape(-1, V)
    tf = targets.reshape(-1)
    logz = jax.nn.logsumexp(lf, axis=-1)
    nll = logz - lf[jnp.arange(lf.shape[0]), tf]
    return lf, jnp.mean(nll)


if __name__ == "__main__":
    vocab_size = 65
    max_new_tokens = 16   # doubles as positional table size (block_size)
    embed_dim = 32
    B, T = 2, 8

    key = jax.random.PRNGKey(0)
    k_tok, k_pos, k_w, k_b, k_idx, k_tgt = jax.random.split(key, 6)
    params = {
        "tok_table": jax.random.normal(k_tok, (vocab_size, embed_dim), jnp.float32),
        "pos_table": jax.random.normal(k_pos, (max_new_tokens, embed_dim), jnp.float32),
        "lm_head_w": 0.1 * jax.random.normal(k_w, (vocab_size, embed_dim), jnp.float32),
        "lm_head_b": 0.1 * jax.random.normal(k_b, (vocab_size,), jnp.float32),
    }
    idx = jax.random.randint(k_idx, (B, T), 0, vocab_size, dtype=jnp.int32)
    targets = jax.random.randint(k_tgt, (B, T), 0, vocab_size, dtype=jnp.int32)

    # One-time parameter prep (hoisted out of the per-step forward).
    prep = prepare_params(params)
    jax.block_until_ready(prep)
    fwd = jax.jit(functools.partial(bigram_forward, prep))
    decode = jax.jit(functools.partial(bigram_last_logits, prep))

    # --- training path (targets given): logits (B*T, V) + scalar loss ---------
    logits_tr, loss = fwd(idx, targets)
    jax.block_until_ready((logits_tr, loss))
    ref_logits_tr, ref_loss = _reference_forward(params, idx, targets)
    assert logits_tr.shape == (B * T, vocab_size)
    assert np.allclose(np.asarray(logits_tr), np.asarray(ref_logits_tr),
                       atol=1e-4, rtol=1e-4)
    assert np.allclose(float(loss), float(ref_loss), atol=1e-4, rtol=1e-4)

    # --- inference path (targets=None): logits (B, T, V), no loss work --------
    logits_inf, loss_inf = fwd(idx)
    jax.block_until_ready(logits_inf)
    ref_logits_inf, _ = _reference_forward(params, idx, None)
    assert loss_inf is None
    assert logits_inf.shape == (B, T, vocab_size)
    assert np.allclose(np.asarray(logits_inf), np.asarray(ref_logits_inf),
                       atol=1e-4, rtol=1e-4)

    # --- decode specialization: last-position padded logits only --------------
    last_logits = decode(idx[:, -1], T - 1)                # (B, Vp), pad-safe
    jax.block_until_ready(last_logits)
    assert last_logits.shape == (B, prep["vocab_padded"])
    assert np.allclose(np.asarray(last_logits[:, :vocab_size]),
                       np.asarray(ref_logits_inf[:, -1, :]),
                       atol=1e-4, rtol=1e-4)

    # TODO(synk): full generate() (autoregressive multinomial sampling) stays a
    # host-side loop; it should call `decode` per step (padded logits, no slice).
    # Fusing the whole decode loop + sampling into one pallas_call (resident
    # bigram_table, pltpu PRNG) is the next step if per-token launch overhead
    # ever matters.
    print("KERNEL_OK")
</pallas_src>

<mosaic_0001>
module attributes {stable_mosaic.version = 11 : i64} {
  func.func @_bigram_kernel(%arg0: memref<16xi32, #tpu.memory_space<smem>>, %arg1: memref<16xi32, #tpu.memory_space<smem>>, %arg2: memref<16x128xf32, #tpu.memory_space<vmem>>, %arg3: memref<128x128xf32, #tpu.memory_space<vmem>>, %arg4: memref<16x128xf32, #tpu.memory_space<vmem>>, %arg5: memref<1x1xf32, #tpu.memory_space<smem>>) attributes {dimension_semantics = [], scalar_prefetch = 0 : i64, scratch_operands = 0 : i64, tpu.core_type = #tpu.core_type<tc>} {
    %0 = tpu.iota {dimensions = array<i32: 1>} : vector<1x128xi32>
    %cst = arith.constant 0.000000e+00 : f32
    %1 = vector.broadcast %cst : f32 to vector<1x128xf32>
    %c0 = arith.constant 0 : index
    %2 = memref.load %arg0[%c0] : memref<16xi32, #tpu.memory_space<smem>>
    %3 = arith.index_cast %2 : i32 to index
    %c0_0 = arith.constant 0 : index
    %4 = vector.load %arg3[%3, %c0_0] : memref<128x128xf32, #tpu.memory_space<vmem>>, vector<1x128xf32>
    %c0_1 = arith.constant 0 : index
    %c0_2 = arith.constant 0 : index
    %5 = vector.load %arg2[%c0_1, %c0_2] : memref<16x128xf32, #tpu.memory_space<vmem>>, vector<1x128xf32>
    %6 = arith.addf %4, %5 : vector<1x128xf32>
    %c0_3 = arith.constant 0 : index
    %c0_4 = arith.constant 0 : index
    %7 = vector.load %arg4[%c0_3, %c0_4] : memref<16x128xf32, #tpu.memory_space<vmem>>, vector<1x128xf32>
    tpu.vector_store %arg4[%c0_3, %c0_4], %6 {strides = array<i32>} : memref<16x128xf32, #tpu.memory_space<vmem>>, vector<1x128xf32>,
    %c0_5 = arith.constant 0 : index
    %8 = memref.load %arg1[%c0_5] : memref<16xi32, #tpu.memory_space<smem>>
    %9 = vector.broadcast %8 : i32 to vector<1x128xi32>
    %10 = arith.cmpi eq, %0, %9 : vector<1x128xi32>
    %cst_6 = arith.constant 0.000000e+00 : f32
    %11 = vector.broadcast %cst_6 : f32 to vector<1x128xf32>
    %12 = arith.select %10, %6, %11 : vector<1x128xi1>, vector<1x128xf32>
    %13 = arith.addf %1, %12 : vector<1x128xf32>
    %c1 = arith.constant 1 : index
    %14 = memref.load %arg0[%c1] : memref<16xi32, #tpu.memory_space<smem>>
    %15 = arith.index_cast %14 : i32 to index
    %c0_7 = arith.constant 0 : index
    %16 = vector.load %arg3[%15, %c0_7] : memref<128x128xf32, #tpu.memory_space<vmem>>, vector<1x128xf32>
    %c1_8 = arith.constant 1 : index
    %c0_9 = arith.constant 0 : index
    %17 = vector.load %arg2[%c1_8, %c0_9] : memref<16x128xf32, #tpu.memory_space<vmem>>, vector<1x128xf32>
    %18 = arith.addf %16, %17 : vector<1x128xf32>
    %c1_10 = arith.constant 1 : index
    %c0_11 = arith.constant 0 : index
    %19 = vector.load %arg4[%c1_10, %c0_11] : memref<16x128xf32, #tpu.memory_space<vmem>>, vector<1x128xf32>
    tpu.vector_store %arg4[%c1_10, %c0_11], %18 {strides = array<i32>} : memref<16x128xf32, #tpu.memory_space<vmem>>, vector<1x128xf32>,
    %c1_12 = arith.constant 1 : index
    %20 = memref.load %arg1[%c1_12] : memref<16xi32, #tpu.memory_space<smem>>
    %21 = vector.broadcast %20 : i32 to vector<1x128xi32>
    %22 = arith.cmpi eq, %0, %21 : vector<1x128xi32>
    %cst_13 = arith.constant 0.000000e+00 : f32
    %23 = vector.broadcast %cst_13 : f32 to vector<1x128xf32>
    %24 = arith.select %22, %18, %23 : vector<1x128xi1>, vector<1x128xf32>
    %25 = arith.addf %13, %24 : vector<1x128xf32>
    %c2 = arith.constant 2 : index
    %26 = memref.load %arg0[%c2] : memref<16xi32, #tpu.memory_space<smem>>
    %27 = arith.index_cast %26 : i32 to index
    %c0_14 = arith.constant 0 : index
    %28 = vector.load %arg3[%27, %c0_14] : memref<128x128xf32, #tpu.memory_space<vmem>>, vector<1x128xf32>
    %c2_15 = arith.constant 2 : index
    %c0_16 = arith.constant 0 : index
    %29 = vector.load %arg2[%c2_15, %c0_16] : memref<16x128xf32, #tpu.memory_space<vmem>>, vector<1x128xf32>
    %30 = arith.addf %28, %29 : vector<1x128xf32>
    %c2_17 = arith.constant 2 : index
    %c0_18 = arith.constant 0 : index
    %31 = vector.load %arg4[%c2_17, %c0_18] : memref<16x128xf32, #tpu.memory_space<vmem>>, vector<1x128xf32>
    tpu.vector_store %arg4[%c2_17, %c0_18], %30 {strides = array<i32>} : memref<16x128xf32, #tpu.memory_space<vmem>>, vector<1x128xf32>,
    %c2_19 = arith.constant 2 : index
    %32 = memref.load %arg1[%c2_19] : memref<16xi32, #tpu.memory_space<smem>>
    %33 = vector.broadcast %32 : i32 to vector<1x128xi32>
    %34 = arith.cmpi eq, %0, %33 : vector<1x128xi32>
    %cst_20 = arith.constant 0.000000e+00 : f32
    %35 = vector.broadcast %cst_20 : f32 to vector<1x128xf32>
    %36 = arith.select %34, %30, %35 : vector<1x128xi1>, vector<1x128xf32>
    %37 = arith.addf %25, %36 : vector<1x128xf32>
    %c3 = arith.constant 3 : index
    %38 = memref.load %arg0[%c3] : memref<16xi32, #tpu.memory_space<smem>>
    %39 = arith.index_cast %38 : i32 to index
    %c0_21 = arith.constant 0 : index
    %40 = vector.load %arg3[%39, %c0_21] : memref<128x128xf32, #tpu.memory_space<vmem>>, vector<1x128xf32>
    %c3_22 = arith.constant 3 : index
    %c0_23 = arith.constant 0 : index
    %41 = vector.load %arg2[%c3_22, %c0_23] : memref<16x128xf32, #tpu.memory_space<vmem>>, vector<1x128xf32>
    %42 = arith.addf %40, %41 : vector<1x128xf32>
    %c3_24 = arith.constant 3 : index
    %c0_25 = arith.constant 0 : index
    %43 = vector.load %arg4[%c3_24, %c0_25] : memref<16x128xf32, #tpu.memory_space<vmem>>, vector<1x128xf32>
    tpu.vector_store %arg4[%c3_24, %c0_25], %42 {strides = array<i32>} : memref<16x128xf32, #tpu.memory_space<vmem>>, vector<1x128xf32>,
    %c3_26 = arith.constant 3 : index
    %44 = memref.load %arg1[%c3_26] : memref<16xi32, #tpu.memory_space<smem>>
    %45 = vector.broadcast %44 : i32 to vector<1x128xi32>
    %46 = arith.cmpi eq, %0, %45 : vector<1x128xi32>
    %cst_27 = arith.constant 0.000000e+00 : f32
    %47 = vector.broadcast %cst_27 : f32 to vector<1x128xf32>
    %48 = arith.select %46, %42, %47 : vector<1x128xi1>, vector<1x128xf32>
    %49 = arith.addf %37, %48 : vector<1x128xf32>
    %c4 = arith.constant 4 : index
    %50 = memref.load %arg0[%c4] : memref<16xi32, #tpu.memory_space<smem>>
    %51 = arith.index_cast %50 : i32 to index
    %c0_28 = arith.constant 0 : index
    %52 = vector.load %arg3[%51, %c0_28] : memref<128x128xf32, #tpu.memory_space<vmem>>, vector<1x128xf32>
    %c4_29 = arith.constant 4 : index
    %c0_30 = arith.constant 0 : index
    %53 = vector.load %arg2[%c4_29, %c0_30] : memref<16x128xf32, #tpu.memory_space<vmem>>, vector<1x128xf32>
    %54 = arith.addf %52, %53 : vector<1x128xf32>
    %c4_31 = arith.constant 4 : index
    %c0_32 = arith.constant 0 : index
    %55 = vector.load %arg4[%c4_31, %c0_32] : memref<16x128xf32, #tpu.memory_space<vmem>>, vector<1x128xf32>
    tpu.vector_store %arg4[%c4_31, %c0_32], %54 {strides = array<i32>} : memref<16x128xf32, #tpu.memory_space<vmem>>, vector<1x128xf32>,
    %c4_33 = arith.constant 4 : index
    %56 = memref.load %arg1[%c4_33] : memref<16xi32, #tpu.memory_space<smem>>
    %57 = vector.broadcast %56 : i32 to vector<1x128xi32>
    %58 = arith.cmpi eq, %0, %57 : vector<1x128xi32>
    %cst_34 = arith.constant 0.000000e+00 : f32
    %59 = vector.broadcast %cst_34 : f32 to vector<1x128xf32>
    %60 = arith.select %58, %54, %59 : vector<1x128xi1>, vector<1x128xf32>
    %61 = arith.addf %49, %60 : vector<1x128xf32>
    %c5 = arith.constant 5 : index
    %62 = memref.load %arg0[%c5] : memref<16xi32, #tpu.memory_space<smem>>
    %63 = arith.index_cast %62 : i32 to index
    %c0_35 = arith.constant 0 : index
    %64 = vector.load %arg3[%63, %c0_35] : memref<128x128xf32, #tpu.memory_space<vmem>>, vector<1x128xf32>
    %c5_36 = arith.constant 5 : index
    %c0_37 = arith.constant 0 : index
    %65 = vector.load %arg2[%c5_36, %c0_37] : memref<16x128xf32, #tpu.memory_space<vmem>>, vector<1x128xf32>
    %66 = arith.addf %64, %65 : vector<1x128xf32>
    %c5_38 = arith.constant 5 : index
    %c0_39 = arith.constant 0 : index
    %67 = vector.load %arg4[%c5_38, %c0_39] : memref<16x128xf32, #tpu.memory_space<vmem>>, vector<1x128xf32>
    tpu.vector_store %arg4[%c5_38, %c0_39], %66 {strides = array<i32>} : memref<16x128xf32, #tpu.memory_space<vmem>>, vector<1x128xf32>,
    %c5_40 = arith.constant 5 : index
    %68 = memref.load %arg1[%c5_40] : memref<16xi32, #tpu.memory_space<smem>>
    %69 = vector.broadcast %68 : i32 to vector<1x128xi32>
    %70 = arith.cmpi eq, %0, %69 : vector<1x128xi32>
    %cst_41 = arith.constant 0.000000e+00 : f32
    %71 = vector.broadcast %cst_41 : f32 to vector<1x128xf32>
    %72 = arith.select %70, %66, %71 : vector<1x128xi1>, vector<1x128xf32>
    %73 = arith.addf %61, %72 : vector<1x128xf32>
    %c6 = arith.constant 6 : index
    %74 = memref.load %arg0[%c6] : memref<16xi32, #tpu.memory_space<smem>>
    %75 = arith.index_cast %74 : i32 to index
    %c0_42 = arith.constant 0 : index
    %76 = vector.load %arg3[%75, %c0_42] : memref<128x128xf32, #tpu.memory_space<vmem>>, vector<1x128xf32>
    %c6_43 = arith.constant 6 : index
    %c0_44 = arith.constant 0 : index
    %77 = vector.load %arg2[%c6_43, %c0_44] : memref<16x128xf32, #tpu.memory_space<vmem>>, vector<1x128xf32>
    %78 = arith.addf %76, %77 : vector<1x128xf32>
    %c6_45 = arith.constant 6 : index
    %c0_46 = arith.constant 0 : index
    %79 = vector.load %arg4[%c6_45, %c0_46] : memref<16x128xf32, #tpu.memory_space<vmem>>, vector<1x128xf32>
    tpu.vector_store %arg4[%c6_45, %c0_46], %78 {strides = array<i32>} : memref<16x128xf32, #tpu.memory_space<vmem>>, vector<1x128xf32>,
    %c6_47 = arith.constant 6 : index
    %80 = memref.load %arg1[%c6_47] : memref<16xi32, #tpu.memory_space<smem>>
    %81 = vector.broadcast %80 : i32 to vector<1x128xi32>
    %82 = arith.cmpi eq, %0, %81 : vector<1x128xi32>
    %cst_48 = arith.constant 0.000000e+00 : f32
    %83 = vector.broadcast %cst_48 : f32 to vector<1x128xf32>
    %84 = arith.select %82, %78, %83 : vector<1x128xi1>, vector<1x128xf32>
    %85 = arith.addf %73, %84 : vector<1x128xf32>
    %c7 = arith.constant 7 : index
    %86 = memref.load %arg0[%c7] : memref<16xi32, #tpu.memory_space<smem>>
    %87 = arith.index_cast %86 : i32 to index
    %c0_49 = arith.constant 0 : index
    %88 = vector.load %arg3[%87, %c0_49] : memref<128x128xf32, #tpu.memory_space<vmem>>, vector<1x128xf32>
    %c7_50 = arith.constant 7 : index
    %c0_51 = arith.constant 0 : index
    %89 = vector.load %arg2[%c7_50, %c0_51] : memref<16x128xf32, #tpu.memory_space<vmem>>, vector<1x128xf32>
    %90 = arith.addf %88, %89 : vector<1x128xf32>
    %c7_52 = arith.constant 7 : index
    %c0_53 = arith.constant 0 : index
    %91 = vector.load %arg4[%c7_52, %c0_53] : memref<16x128xf32, #tpu.memory_space<vmem>>, vector<1x128xf32>
    tpu.vector_store %arg4[%c7_52, %c0_53], %90 {strides = array<i32>} : memref<16x128xf32, #tpu.memory_space<vmem>>, vector<1x128xf32>,
    %c7_54 = arith.constant 7 : index
    %92 = memref.load %arg1[%c7_54] : memref<16xi32, #tpu.memory_space<smem>>
    %93 = vector.broadcast %92 : i32 to vector<1x128xi32>
    %94 = arith.cmpi eq, %0, %93 : vector<1x128xi32>
    %cst_55 = arith.constant 0.000000e+00 : f32
    %95 = vector.broadcast %cst_55 : f32 to vector<1x128xf32>
    %96 = arith.select %94, %90, %95 : vector<1x128xi1>, vector<1x128xf32>
    %97 = arith.addf %85, %96 : vector<1x128xf32>
    %c8 = arith.constant 8 : index
    %98 = memref.load %arg0[%c8] : memref<16xi32, #tpu.memory_space<smem>>
    %99 = arith.index_cast %98 : i32 to index
    %c0_56 = arith.constant 0 : index
    %100 = vector.load %arg3[%99, %c0_56] : memref<128x128xf32, #tpu.memory_space<vmem>>, vector<1x128xf32>
    %c0_57 = arith.constant 0 : index
    %c0_58 = arith.constant 0 : index
    %101 = vector.load %arg2[%c0_57, %c0_58] : memref<16x128xf32, #tpu.memory_space<vmem>>, vector<1x128xf32>
    %102 = arith.addf %100, %101 : vector<1x128xf32>
    %c8_59 = arith.constant 8 : index
    %c0_60 = arith.constant 0 : index
    %103 = vector.load %arg4[%c8_59, %c0_60] : memref<16x128xf32, #tpu.memory_space<vmem>>, vector<1x128xf32>
    tpu.vector_store %arg4[%c8_59, %c0_60], %102 {strides = array<i32>} : memref<16x128xf32, #tpu.memory_space<vmem>>, vector<1x128xf32>,
    %c8_61 = arith.constant 8 : index
    %104 = memref.load %arg1[%c8_61] : memref<16xi32, #tpu.memory_space<smem>>
    %105 = vector.broadcast %104 : i32 to vector<1x128xi32>
    %106 = arith.cmpi eq, %0, %105 : vector<1x128xi32>
    %cst_62 = arith.constant 0.000000e+00 : f32
    %107 = vector.broadcast %cst_62 : f32 to vector<1x128xf32>
    %108 = arith.select %106, %102, %107 : vector<1x128xi1>, vector<1x128xf32>
    %109 = arith.addf %97, %108 : vector<1x128xf32>
    %c9 = arith.constant 9 : index
    %110 = memref.load %arg0[%c9] : memref<16xi32, #tpu.memory_space<smem>>
    %111 = arith.index_cast %110 : i32 to index
    %c0_63 = arith.constant 0 : index
    %112 = vector.load %arg3[%111, %c0_63] : memref<128x128xf32, #tpu.memory_space<vmem>>, vector<1x128xf32>
    %c1_64 = arith.constant 1 : index
    %c0_65 = arith.constant 0 : index
    %113 = vector.load %arg2[%c1_64, %c0_65] : memref<16x128xf32, #tpu.memory_space<vmem>>, vector<1x128xf32>
    %114 = arith.addf %112, %113 : vector<1x128xf32>
    %c9_66 = arith.constant 9 : index
    %c0_67 = arith.constant 0 : index
    %115 = vector.load %arg4[%c9_66, %c0_67] : memref<16x128xf32, #tpu.memory_space<vmem>>, vector<1x128xf32>
    tpu.vector_store %arg4[%c9_66, %c0_67], %114 {strides = array<i32>} : memref<16x128xf32, #tpu.memory_space<vmem>>, vector<1x128xf32>,
    %c9_68 = arith.constant 9 : index
    %116 = memref.load %arg1[%c9_68] : memref<16xi32, #tpu.memory_space<smem>>
    %117 = vector.broadcast %116 : i32 to vector<1x128xi32>
    %118 = arith.cmpi eq, %0, %117 : vector<1x128xi32>
    %cst_69 = arith.constant 0.000000e+00 : f32
    %119 = vector.broadcast %cst_69 : f32 to vector<1x128xf32>
    %120 = arith.select %118, %114, %119 : vector<1x128xi1>, vector<1x128xf32>
    %121 = arith.addf %109, %120 : vector<1x128xf32>
    %c10 = arith.constant 10 : index
    %122 = memref.load %arg0[%c10] : memref<16xi32, #tpu.memory_space<smem>>
    %123 = arith.index_cast %122 : i32 to index
    %c0_70 = arith.constant 0 : index
    %124 = vector.load %arg3[%123, %c0_70] : memref<128x128xf32, #tpu.memory_space<vmem>>, vector<1x128xf32>
    %c2_71 = arith.constant 2 : index
    %c0_72 = arith.constant 0 : index
    %125 = vector.load %arg2[%c2_71, %c0_72] : memref<16x128xf32, #tpu.memory_space<vmem>>, vector<1x128xf32>
    %126 = arith.addf %124, %125 : vector<1x128xf32>
    %c10_73 = arith.constant 10 : index
    %c0_74 = arith.constant 0 : index
    %127 = vector.load %arg4[%c10_73, %c0_74] : memref<16x128xf32, #tpu.memory_space<vmem>>, vector<1x128xf32>
    tpu.vector_store %arg4[%c10_73, %c0_74], %126 {strides = array<i32>} : memref<16x128xf32, #tpu.memory_space<vmem>>, vector<1x128xf32>,
    %c10_75 = arith.constant 10 : index
    %128 = memref.load %arg1[%c10_75] : memref<16xi32, #tpu.memory_space<smem>>
    %129 = vector.broadcast %128 : i32 to vector<1x128xi32>
    %130 = arith.cmpi eq, %0, %129 : vector<1x128xi32>
    %cst_76 = arith.constant 0.000000e+00 : f32
    %131 = vector.broadcast %cst_76 : f32 to vector<1x128xf32>
    %132 = arith.select %130, %126, %131 : vector<1x128xi1>, vector<1x128xf32>
    %133 = arith.addf %121, %132 : vector<1x128xf32>
    %c11 = arith.constant 11 : index
    %134 = memref.load %arg0[%c11] : memref<16xi32, #tpu.memory_space<smem>>
    %135 = arith.index_cast %134 : i32 to index
    %c0_77 = arith.constant 0 : index
    %136 = vector.load %arg3[%135, %c0_77] : memref<128x128xf32, #tpu.memory_space<vmem>>, vector<1x128xf32>
    %c3_78 = arith.constant 3 : index
    %c0_79 = arith.constant 0 : index
    %137 = vector.load %arg2[%c3_78, %c0_79] : memref<16x128xf32, #tpu.memory_space<vmem>>, vector<1x128xf32>
    %138 = arith.addf %136, %137 : vector<1x128xf32>
    %c11_80 = arith.constant 11 : index
    %c0_81 = arith.constant 0 : index
    %139 = vector.load %arg4[%c11_80, %c0_81] : memref<16x128xf32, #tpu.memory_space<vmem>>, vector<1x128xf32>
    tpu.vector_store %arg4[%c11_80, %c0_81], %138 {strides = array<i32>} : memref<16x128xf32, #tpu.memory_space<vmem>>, vector<1x128xf32>,
    %c11_82 = arith.constant 11 : index
    %140 = memref.load %arg1[%c11_82] : memref<16xi32, #tpu.memory_space<smem>>
    %141 = vector.broadcast %140 : i32 to vector<1x128xi32>
    %142 = arith.cmpi eq, %0, %141 : vector<1x128xi32>
    %cst_83 = arith.constant 0.000000e+00 : f32
    %143 = vector.broadcast %cst_83 : f32 to vector<1x128xf32>
    %144 = arith.select %142, %138, %143 : vector<1x128xi1>, vector<1x128xf32>
    %145 = arith.addf %133, %144 : vector<1x128xf32>
    %c12 = arith.constant 12 : index
    %146 = memref.load %arg0[%c12] : memref<16xi32, #tpu.memory_space<smem>>
    %147 = arith.index_cast %146 : i32 to index
    %c0_84 = arith.constant 0 : index
    %148 = vector.load %arg3[%147, %c0_84] : memref<128x128xf32, #tpu.memory_space<vmem>>, vector<1x128xf32>
    %c4_85 = arith.constant 4 : index
    %c0_86 = arith.constant 0 : index
    %149 = vector.load %arg2[%c4_85, %c0_86] : memref<16x128xf32, #tpu.memory_space<vmem>>, vector<1x128xf32>
    %150 = arith.addf %148, %149 : vector<1x128xf32>
    %c12_87 = arith.constant 12 : index
    %c0_88 = arith.constant 0 : index
    %151 = vector.load %arg4[%c12_87, %c0_88] : memref<16x128xf32, #tpu.memory_space<vmem>>, vector<1x128xf32>
    tpu.vector_store %arg4[%c12_87, %c0_88], %150 {strides = array<i32>} : memref<16x128xf32, #tpu.memory_space<vmem>>, vector<1x128xf32>,
    %c12_89 = arith.constant 12 : index
    %152 = memref.load %arg1[%c12_89] : memref<16xi32, #tpu.memory_space<smem>>
    %153 = vector.broadcast %152 : i32 to vector<1x128xi32>
    %154 = arith.cmpi eq, %0, %153 : vector<1x128xi32>
    %cst_90 = arith.constant 0.000000e+00 : f32
    %155 = vector.broadcast %cst_90 : f32 to vector<1x128xf32>
    %156 = arith.select %154, %150, %155 : vector<1x128xi1>, vector<1x128xf32>
    %157 = arith.addf %145, %156 : vector<1x128xf32>
    %c13 = arith.constant 13 : index
    %158 = memref.load %arg0[%c13] : memref<16xi32, #tpu.memory_space<smem>>
    %159 = arith.index_cast %158 : i32 to index
    %c0_91 = arith.constant 0 : index
    %160 = vector.load %arg3[%159, %c0_91] : memref<128x128xf32, #tpu.memory_space<vmem>>, vector<1x128xf32>
    %c5_92 = arith.constant 5 : index
    %c0_93 = arith.constant 0 : index
    %161 = vector.load %arg2[%c5_92, %c0_93] : memref<16x128xf32, #tpu.memory_space<vmem>>, vector<1x128xf32>
    %162 = arith.addf %160, %161 : vector<1x128xf32>
    %c13_94 = arith.constant 13 : index
    %c0_95 = arith.constant 0 : index
    %163 = vector.load %arg4[%c13_94, %c0_95] : memref<16x128xf32, #tpu.memory_space<vmem>>, vector<1x128xf32>
    tpu.vector_store %arg4[%c13_94, %c0_95], %162 {strides = array<i32>} : memref<16x128xf32, #tpu.memory_space<vmem>>, vector<1x128xf32>,
    %c13_96 = arith.constant 13 : index
    %164 = memref.load %arg1[%c13_96] : memref<16xi32, #tpu.memory_space<smem>>
    %165 = vector.broadcast %164 : i32 to vector<1x128xi32>
    %166 = arith.cmpi eq, %0, %165 : vector<1x128xi32>
    %cst_97 = arith.constant 0.000000e+00 : f32
    %167 = vector.broadcast %cst_97 : f32 to vector<1x128xf32>
    %168 = arith.select %166, %162, %167 : vector<1x128xi1>, vector<1x128xf32>
    %169 = arith.addf %157, %168 : vector<1x128xf32>
    %c14 = arith.constant 14 : index
    %170 = memref.load %arg0[%c14] : memref<16xi32, #tpu.memory_space<smem>>
    %171 = arith.index_cast %170 : i32 to index
    %c0_98 = arith.constant 0 : index
    %172 = vector.load %arg3[%171, %c0_98] : memref<128x128xf32, #tpu.memory_space<vmem>>, vector<1x128xf32>
    %c6_99 = arith.constant 6 : index
    %c0_100 = arith.constant 0 : index
    %173 = vector.load %arg2[%c6_99, %c0_100] : memref<16x128xf32, #tpu.memory_space<vmem>>, vector<1x128xf32>
    %174 = arith.addf %172, %173 : vector<1x128xf32>
    %c14_101 = arith.constant 14 : index
    %c0_102 = arith.constant 0 : index
    %175 = vector.load %arg4[%c14_101, %c0_102] : memref<16x128xf32, #tpu.memory_space<vmem>>, vector<1x128xf32>
    tpu.vector_store %arg4[%c14_101, %c0_102], %174 {strides = array<i32>} : memref<16x128xf32, #tpu.memory_space<vmem>>, vector<1x128xf32>,
    %c14_103 = arith.constant 14 : index
    %176 = memref.load %arg1[%c14_103] : memref<16xi32, #tpu.memory_space<smem>>
    %177 = vector.broadcast %176 : i32 to vector<1x128xi32>
    %178 = arith.cmpi eq, %0, %177 : vector<1x128xi32>
    %cst_104 = arith.constant 0.000000e+00 : f32
    %179 = vector.broadcast %cst_104 : f32 to vector<1x128xf32>
    %180 = arith.select %178, %174, %179 : vector<1x128xi1>, vector<1x128xf32>
    %181 = arith.addf %169, %180 : vector<1x128xf32>
    %c15 = arith.constant 15 : index
    %182 = memref.load %arg0[%c15] : memref<16xi32, #tpu.memory_space<smem>>
    %183 = arith.index_cast %182 : i32 to index
    %c0_105 = arith.constant 0 : index
    %184 = vector.load %arg3[%183, %c0_105] : memref<128x128xf32, #tpu.memory_space<vmem>>, vector<1x128xf32>
    %c7_106 = arith.constant 7 : index
    %c0_107 = arith.constant 0 : index
    %185 = vector.load %arg2[%c7_106, %c0_107] : memref<16x128xf32, #tpu.memory_space<vmem>>, vector<1x128xf32>
    %186 = arith.addf %184, %185 : vector<1x128xf32>
    %c15_108 = arith.constant 15 : index
    %c0_109 = arith.constant 0 : index
    %187 = vector.load %arg4[%c15_108, %c0_109] : memref<16x128xf32, #tpu.memory_space<vmem>>, vector<1x128xf32>
    tpu.vector_store %arg4[%c15_108, %c0_109], %186 {strides = array<i32>} : memref<16x128xf32, #tpu.memory_space<vmem>>, vector<1x128xf32>,
    %c15_110 = arith.constant 15 : index
    %188 = memref.load %arg1[%c15_110] : memref<16xi32, #tpu.memory_space<smem>>
    %189 = vector.broadcast %188 : i32 to vector<1x128xi32>
    %190 = arith.cmpi eq, %0, %189 : vector<1x128xi32>
    %cst_111 = arith.constant 0.000000e+00 : f32
    %191 = vector.broadcast %cst_111 : f32 to vector<1x128xf32>
    %192 = arith.select %190, %186, %191 : vector<1x128xi1>, vector<1x128xf32>
    %193 = arith.addf %181, %192 : vector<1x128xf32>
    %c0_112 = arith.constant 0 : index
    %c0_113 = arith.constant 0 : index
    %194 = vector.load %arg4[%c0_112, %c0_113] : memref<16x128xf32, #tpu.memory_space<vmem>>, vector<16x128xf32>
    %cst_114 = arith.constant dense<0xFF800000> : vector<16xf32>
    %195 = vector.multi_reduction <maximumf>, %194, %cst_114 [1] : vector<16x128xf32> to vector<16xf32>
    %196 = vector.shape_cast %195 : vector<16xf32> to vector<16x1xf32>
    %197 = vector.broadcast %196 : vector<16x1xf32> to vector<16x128xf32>
    %198 = arith.subf %194, %197 : vector<16x128xf32>
    %199 = math.exp %198 : vector<16x128xf32>
    %cst_115 = arith.constant dense<0.000000e+00> : vector<16xf32>
    %200 = vector.multi_reduction <add>, %199, %cst_115 [1] : vector<16x128xf32> to vector<16xf32>
    %201 = vector.shape_cast %200 : vector<16xf32> to vector<16x1xf32>
    %202 = math.log %201 : vector<16x1xf32>
    %203 = arith.addf %202, %196 : vector<16x1xf32>
    %204 = vector.shape_cast %193 : vector<1x128xf32> to vector<1x1x128xf32>
    %cst_116 = arith.constant dense<0.000000e+00> : vector<1xf32>
    %205 = vector.multi_reduction <add>, %204, %cst_116 [1, 2] : vector<1x1x128xf32> to vector<1xf32>
    %206 = vector.shape_cast %205 : vector<1xf32> to vector<1x1x1xf32>
    %207 = vector.extract %206[0, 0, 0] : f32 from vector<1x1x1xf32>
    %208 = vector.shape_cast %203 : vector<16x1xf32> to vector<1x16x1xf32>
    %cst_117 = arith.constant dense<0.000000e+00> : vector<1xf32>
    %209 = vector.multi_reduction <add>, %208, %cst_117 [1, 2] : vector<1x16x1xf32> to vector<1xf32>
    %210 = vector.shape_cast %209 : vector<1xf32> to vector<1x1x1xf32>
    %211 = vector.extract %210[0, 0, 0] : f32 from vector<1x1x1xf32>
    %212 = arith.subf %211, %207 : f32
    %cst_118 = arith.constant 1.600000e+01 : f32
    %213 = arith.divf %212, %cst_118 : f32
    %c0_119 = arith.constant 0 : index
    %c0_120 = arith.constant 0 : index
    %214 = memref.load %arg5[%c0_119, %c0_120] : memref<1x1xf32, #tpu.memory_space<smem>>
    memref.store %213, %arg5[%c0_119, %c0_120] : memref<1x1xf32, #tpu.memory_space<smem>>
    return
  }
}

</mosaic_0001>

<bundles_post_ra>
// kernel: bigram_forward.1
= control target key start
LH: loop header
LB: loop body
LE: loop exit
PB: predicated region body
PF: predicated region fallthrough
CT: control target
= control target key end

     0   :  { %11 = vsyncpa [#allocation6], 0  ;;  %s721_s0 = inlined_call_operand.vmem [shape: s32[16], index: 0, kind: input, shape index: {}]   ;;  %s722_s1 = inlined_call_operand.vmem [shape: s32[16], index: 1, kind: input, shape index: {}]   ;;  %s723_s2 = inlined_call_operand.hbm [shape: f32[16,128], index: 2, kind: input, shape index: {}]   ;;  %s724_s3 = inlined_call_operand.hbm [shape: f32[128,128], index: 3, kind: input, shape index: {}]   ;;  %s725_s4 = inlined_call_operand.hbm [shape: f32[16,128], index: 4, kind: output, shape index: {0}]   ;;  %s726_s5 = inlined_call_operand.hbm [shape: f32[1,1], index: 5, kind: output, shape index: {1}]  }
   0x1   :  { %12 = vsyncpa [#allocation8], 0 }
   0x2   :  { %13 = vsyncpa [#allocation3], 0 }
   0x3   :  { %14 = vsyncpa [#allocation11], 0 }
   0x4   :  { %15 = vsyncpa [#allocation4], 0 }
   0x5   :  { %16 = vsyncpa [#allocation5], 0  ;;  %s23_s20 = sshll.u32 %s721_s0, 4  ;;  %s33_s23 = sshll.u32 %s722_s1, 4  ;;  %s24_s20 = int_to_ptr.vmem [resolvable:$true] %s23_s20  ;;  %s34_s23 = int_to_ptr.vmem [resolvable:$true] %s33_s23 }
   0x6   :  { %s403_s24 = scalar_lea.vmem %s24_s20, 16  ;;  %p408_p1 = scmp.lt.s32.totalorder %s24_s20, %s24_s20 }
   0x7   :  { %p404_p0 = scmp.ne.s32.totalorder %s24_s20, %s403_s24  ;;  %p409_p2 = scmp.lt.s32.totalorder %s403_s24, %s403_s24 }
   0x9   :  { %p410_p3 = por %p409_p2, %p408_p1 }
   0xb   :  { %p411_p4 = pnand %p410_p3, %p404_p0 }
   0xd   :  { %414 = shalt.err (!%p411_p4)
}
   0xe   :  { %s515_s25 = smov [#allocation2]   ;;  %s415_s26 = scalar_lea.vmem %s34_s23, 16 }
   0xf   :  { %26 = dma.vmem_to_smem %s24_s20, 16, %s515_s25, [#allocation6]  }
  0x10   :  { %p416_p5 = scmp.ne.s32.totalorder %s34_s23, %s415_s26  ;;  %p420_p6 = scmp.lt.s32.totalorder %s34_s23, %s34_s23 }
  0x11   :  { %p421_p7 = scmp.lt.s32.totalorder %s415_s26, %s415_s26 }
  0x13   :  { %p422_p8 = por %p421_p7, %p420_p6 }
  0x15   :  { %p423_p9 = pnand %p422_p8, %p416_p5 }
  0x17   :  { %426 = shalt.err (!%p423_p9)
}
  0x18   :  { %s516_s0 = smov [#allocation7]   ;;  %s517_s1 = smov [#allocation9]  }
  0x19   :  { %36 = dma.vmem_to_smem %s34_s23, 16, %s516_s0, [#allocation8]  }
  0x1a   :  { %s42_s27 = sshll.u32 %s517_s1, 4  ;;  %s427_s30 = scalar_lea.hbm %s723_s2, 256  ;;  %s43_s27 = int_to_ptr.vmem [resolvable:$true] %s42_s27 }
  0x1b   :  { %p428_p10 = scmp.ne.s32.totalorder %s723_s2, %s427_s30  ;;  %p431_p11 = scmp.lt.u32.totalorder %s427_s30, %s723_s2 }
  0x1d   :  { %p433_p12 = pnand %p431_p11, %p428_p10 }
  0x1f   :  { %436 = shalt.err (!%p433_p12)
}
  0x20   :  { %s437_s10 = scalar_lea.vmem %s43_s27, 256  ;;  %p442_p0 = scmp.lt.s32.totalorder %s43_s27, %s43_s27 }
  0x21   :  { %p438_p13 = scmp.ne.s32.totalorder %s43_s27, %s437_s10  ;;  %p443_p1 = scmp.lt.s32.totalorder %s437_s10, %s437_s10 }
  0x23   :  { %p444_p2 = por %p443_p1, %p442_p0 }
  0x25   :  { %p445_p3 = pnand %p444_p2, %p438_p13 }
  0x27   :  { %448 = shalt.err (!%p445_p3)
}
  0x28   :  { %s518_s11 = smov 128   ;;  %s519_s12 = smov 8  }
  0x29   :  { %48 = dma.hbm_to_vmem [thread:$0]  %s723_s2, 256, %s43_s27, [#allocation3], %s518_s11, %s518_s11, %s519_s12  }
  0x2a   :  { %s520_s15 = smov [#allocation10]   ;;  %s449_s19 = scalar_lea.hbm %s724_s3, 2048 }
  0x2b   :  { %s54_s16 = sshll.u32 %s520_s15, 4  ;;  %p450_p4 = scmp.ne.s32.totalorder %s724_s3, %s449_s19  ;;  %s55_s16 = int_to_ptr.vmem [resolvable:$true] %s54_s16 }
  0x2c   :  { %p453_p5 = scmp.lt.u32.totalorder %s449_s19, %s724_s3 }
  0x2e   :  { %p455_p6 = pnand %p453_p5, %p450_p4 }
  0x30   :  { %458 = shalt.err (!%p455_p6)
}
  0x31   :  { %s459_s24 = scalar_lea.vmem %s55_s16, 2048  ;;  %p464_p8 = scmp.lt.s32.totalorder %s55_s16, %s55_s16 }
  0x32   :  { %p460_p7 = scmp.ne.s32.totalorder %s55_s16, %s459_s24  ;;  %p465_p9 = scmp.lt.s32.totalorder %s459_s24, %s459_s24 }
  0x34   :  { %p466_p10 = por %p465_p9, %p464_p8 }
  0x36   :  { %p467_p11 = pnand %p466_p10, %p460_p7 }
  0x38   :  { %470 = shalt.err (!%p467_p11)
}
  0x39   :  { %60 = dma.hbm_to_vmem [thread:$0]  %s724_s3, 2048, %s55_s16, [#allocation11], %s518_s11, %s518_s11, %s519_s12  }
  0x3a   :  { %503 = dma.done.wait [#allocation6], 16  }
  0x3b   :  { %504 = vsyncadd [#allocation6], 4294967280 }
  0x3c   :  { %505 = dma.done.wait [#allocation8], 16  }
  0x3d   :  { %506 = vsyncadd [#allocation8], 4294967280 }
  0x3e   :  { %507 = dma.done.wait [#allocation3], 256  }
  0x3f   :  { %508 = vsyncadd [#allocation3], 4294967040 }
  0x40   :  { %509 = dma.done.wait [#allocation11], 2048  }
  0x41   :  { %510 = vsyncadd [#allocation11], 4294965248 }
  0x42   :  { %73 = sfence }
  0x43   :  { %s76_s26 = sld [smem:[#allocation2]]  ;;  %s353_s0 = sld [smem:[#allocation2 + $0x1]]  ;;  %v79_v0 = vld [vmem:[#allocation9] sm:$0x1]  ;;  %v90_v1 = vld [vmem:[#allocation9 + $0x1] sm:$0x1]  ;;  %v74_v57 = vlaneseq }
  0x44   :  { %s355_s1 = sld [smem:[#allocation2 + $0x2]]  ;;  %s357_s27 = sld [smem:[#allocation2 + $0x3]]  ;;  %v101_v2 = vld [vmem:[#allocation9 + $0x2] sm:$0x1]  ;;  %v112_v3 = vld [vmem:[#allocation9 + $0x3] sm:$0x1] }
  0x45   :  { %s359_s28 = sld [smem:[#allocation2 + $0x4]]  ;;  %s589_s29 = sld [smem:[#allocation2 + $0x5]]  ;;  %v123_v4 = vld [vmem:[#allocation9 + $0x4] sm:$0x1]  ;;  %v134_v5 = vld [vmem:[#allocation9 + $0x5] sm:$0x1] }
  0x46   :  { %s591_s30 = sld [smem:[#allocation2 + $0x6]]  ;;  %s593_s3 = sld [smem:[#allocation2 + $0x7]]  ;;  %v145_v8 = vld [vmem:[#allocation9 + $0x6] sm:$0x1]  ;;  %v156_v12 = vld [vmem:[#allocation9 + $0x7] sm:$0x1] }
  0x47   :  { %s595_s6 = sld [smem:[#allocation2 + $0x8]]  ;;  %v167_v19 = vld [vmem:[#allocation9] sm:$0x1]  ;;  %s369_s18 = sld [smem:[#allocation2 + $0x9]]  ;;  %v178_v27 = vld [vmem:[#allocation9 + $0x1] sm:$0x1] }
  0x48   :  { %s371_s19 = sld [smem:[#allocation2 + $0xa]]  ;;  %s373_s20 = sld [smem:[#allocation2 + $0xb]]  ;;  %v189_v28 = vld [vmem:[#allocation9 + $0x2] sm:$0x1]  ;;  %v200_v29 = vld [vmem:[#allocation9 + $0x3] sm:$0x1] }
  0x49   :  { %s77_s7 = scalar_lea.vmem [#allocation10], %s76_s26  ;;  %s88_s8 = scalar_lea.vmem [#allocation10], %s353_s0  ;;  %v211_v30 = vld [vmem:[#allocation9 + $0x4] sm:$0x1]  ;;  %v222_v31 = vld [vmem:[#allocation9 + $0x5] sm:$0x1] }
  0x4a   :  { %v78_v6 = vld [vmem:[%s77_s7] sm:$0x1]  ;;  %s99_s9 = scalar_lea.vmem [#allocation10], %s355_s1  ;;  %s110_s10 = scalar_lea.vmem [#allocation10], %s357_s27  ;;  %v233_v32 = vld [vmem:[#allocation9 + $0x6] sm:$0x1] }
  0x4b   :  { %v89_v7 = vld [vmem:[%s88_s8] sm:$0x1]  ;;  %v597_v9 = vadd.f32 %v79_v0, %v78_v6  ;;  %s121_s13 = scalar_lea.vmem [#allocation10], %s359_s28  ;;  %s132_s14 = scalar_lea.vmem [#allocation10], %s589_s29  ;;  %v244_v33 = vld [vmem:[#allocation9 + $0x7] sm:$0x1] }
  0x4c   :  { %v599_v10 = vadd.f32 %v90_v1, %v89_v7  ;;  %v100_v11 = vld [vmem:[%s99_s9] sm:$0x1]  ;;  %s143_s15 = scalar_lea.vmem [#allocation10], %s591_s30  ;;  %s154_s16 = scalar_lea.vmem [#allocation10], %s593_s3  ;;  %v658_v58 = vand.u32 127, %v74_v57 }
  0x4d   :  { %v601_v13 = vadd.f32 %v101_v2, %v100_v11  ;;  %v111_v14 = vld [vmem:[%s110_s10] sm:$0x1]  ;;  %81 = vst [vmem:[#allocation12] sm:$0x1] %v597_v9  ;;  %s165_s17 = scalar_lea.vmem [#allocation10], %s595_s6  ;;  %s375_s21 = sld [smem:[#allocation2 + $0xc]] }
  0x4e   :  { %v122_v15 = vld [vmem:[%s121_s13] sm:$0x1]  ;;  %92 = vst [vmem:[#allocation12 + $0x1] sm:$0x1] %v599_v10  ;;  %v605_v16 = vadd.f32 %v112_v3, %v111_v14  ;;  %s377_s22 = sld [smem:[#allocation2 + $0xd]]  ;;  %s379_s23 = sld [smem:[#allocation2 + $0xe]] }
  0x4f   :  { %v607_v17 = vadd.f32 %v123_v4, %v122_v15  ;;  %v133_v18 = vld [vmem:[%s132_s14] sm:$0x1]  ;;  %103 = vst [vmem:[#allocation12 + $0x2] sm:$0x1] %v601_v13  ;;  %s628_s24 = sld [smem:[#allocation2 + $0xf]]  ;;  %s176_s2 = scalar_lea.vmem [#allocation10], %s369_s18 }
  0x50   :  { %v611_v20 = vadd.f32 %v134_v5, %v133_v18  ;;  %v144_v21 = vld [vmem:[%s143_s15] sm:$0x1]  ;;  %114 = vst [vmem:[#allocation12 + $0x3] sm:$0x1] %v605_v16  ;;  %s187_s25 = scalar_lea.vmem [#allocation10], %s371_s19  ;;  %s198_s26 = scalar_lea.vmem [#allocation10], %s373_s20 }
  0x51   :  { %v155_v22 = vld [vmem:[%s154_s16] sm:$0x1]  ;;  %125 = vst [vmem:[#allocation12 + $0x4] sm:$0x1] %v607_v17  ;;  %v617_v23 = vadd.f32 %v145_v8, %v144_v21  ;;  %s82_s29 = sld [smem:[#allocation7]]  ;;  %s354_s30 = sld [smem:[#allocation7 + $0x1]] }
  0x52   :  { %v619_v24 = vadd.f32 %v156_v12, %v155_v22  ;;  %v166_v25 = vld [vmem:[%s165_s17] sm:$0x1]  ;;  %136 = vst [vmem:[#allocation12 + $0x5] sm:$0x1] %v611_v20  ;;  %s356_s3 = sld [smem:[#allocation7 + $0x2]]  ;;  %s358_s6 = sld [smem:[#allocation7 + $0x3]] }
  0x53   :  { %v623_v26 = vadd.f32 %v167_v19, %v166_v25  ;;  %147 = vst [vmem:[#allocation12 + $0x6] sm:$0x1] %v617_v23  ;;  %v177_v34 = vld [vmem:[%s176_s2] sm:$0x1]  ;;  %s209_s0 = scalar_lea.vmem [#allocation10], %s375_s21  ;;  %s360_s7 = sld [smem:[#allocation7 + $0x4]] }
  0x54   :  { %158 = vst [vmem:[#allocation12 + $0x7] sm:$0x1] %v619_v24  ;;  %v188_v35 = vld [vmem:[%s187_s25] sm:$0x1]  ;;  %v630_v36 = vadd.f32 %v178_v27, %v177_v34  ;;  %s220_s1 = scalar_lea.vmem [#allocation10], %s377_s22  ;;  %s231_s27 = scalar_lea.vmem [#allocation10], %s379_s23 }
  0x55   :  { %169 = vst [vmem:[#allocation12 + $0x8] sm:$0x1] %v623_v26  ;;  %v632_v37 = vadd.f32 %v189_v28, %v188_v35  ;;  %v199_v38 = vld [vmem:[%s198_s26] sm:$0x1]  ;;  %s242_s28 = scalar_lea.vmem [#allocation10], %s628_s24  ;;  %s362_s8 = sld [smem:[#allocation7 + $0x5]] }
  0x56   :  { %v210_v39 = vld [vmem:[%s209_s0] sm:$0x1]  ;;  %v634_v41 = vadd.f32 %v200_v29, %v199_v38  ;;  %180 = vst [vmem:[#allocation12 + $0x9] sm:$0x1] %v630_v36  ;;  %s364_s9 = sld [smem:[#allocation7 + $0x6]]  ;;  %s366_s10 = sld [smem:[#allocation7 + $0x7]] }
  0x57   :  { %v636_v42 = vadd.f32 %v211_v30, %v210_v39  ;;  %v221_v43 = vld [vmem:[%s220_s1] sm:$0x1]  ;;  %191 = vst [vmem:[#allocation12 + $0xa] sm:$0x1] %v632_v37  ;;  %v83_v59 = vstv %s82_s29  ;;  %v94_v60 = vstv %s354_s30  ;;  %s368_s13 = sld [smem:[#allocation7 + $0x8]]  ;;  %s370_s14 = sld [smem:[#allocation7 + $0x9]] }
  0x58   :  { %v232_v44 = vld [vmem:[%s231_s27] sm:$0x1]  ;;  %v640_v45 = vadd.f32 %v222_v31, %v221_v43  ;;  %202 = vst [vmem:[#allocation12 + $0xb] sm:$0x1] %v634_v41  ;;  %vm84_vm0 = vcmp.eq.s32.totalorder %v658_v58, %v83_v59  ;;  %vm95_vm1 = vcmp.eq.s32.totalorder %v658_v58, %v94_v60  ;;  %v105_v63 = vstv %s356_s3  ;;  %s372_s15 = sld [smem:[#allocation7 + $0xa]]  ;;  %s374_s16 = sld [smem:[#allocation7 + $0xb]] }
  0x59   :  { %v642_v46 = vadd.f32 %v233_v32, %v232_v44  ;;  %v243_v47 = vld [vmem:[%s242_s28] sm:$0x1]  ;;  %213 = vst [vmem:[#allocation12 + $0xc] sm:$0x1] %v636_v42  ;;  %v85_v61 = vsel %vm84_vm0, %v597_v9, 0.0  ;;  %v96_v62 = vsel %vm95_vm1, %v599_v10, 0.0  ;;  %vm106_vm2 = vcmp.eq.s32.totalorder %v658_v58, %v105_v63 }
  0x5a   :  { %v647_v48 = vadd.f32 %v244_v33, %v243_v47  ;;  %224 = vst [vmem:[#allocation12 + $0xd] sm:$0x1] %v640_v45  ;;  %v97_v0 = vadd.f32 %v96_v62, %v85_v61  ;;  %v107_v1 = vsel %vm106_vm2, %v601_v13, 0.0  ;;  %v116_v2 = vstv %s358_s6  ;;  %s376_s17 = sld [smem:[#allocation7 + $0xc]]  ;;  %s378_s18 = sld [smem:[#allocation7 + $0xd]] }
  0x5b   :  { %v252_v40 = vld [vmem:[#allocation12] sm:$0xff]  ;;  %235 = vst [vmem:[#allocation12 + $0xe] sm:$0x1] %v642_v46  ;;  %vm117_vm3 = vcmp.eq.s32.totalorder %v658_v58, %v116_v2  ;;  %v127_v5 = vstv %s360_s7  ;;  %v138_v9 = vstv %s362_s8  ;;  %s380_s19 = sld [smem:[#allocation7 + $0xe]]  ;;  %s382_s20 = sld [smem:[#allocation7 + $0xf]]  ;;  %vm274_vm0 = vcmask 1040384  }
  0x5c   :  { %254 = vmax.xlane.f32.xlu0 %v252_v40  ;;  %246 = vst [vmem:[#allocation12 + $0xf] sm:$0x1] %v647_v48  ;;  %v108_v3 = vadd.f32 %v107_v1, %v97_v0  ;;  %v118_v4 = vsel %vm117_vm3, %v605_v16, 0.0  ;;  %vm128_vm4 = vcmp.eq.s32.totalorder %v658_v58, %v127_v5  ;;  %vm139_vm5 = vcmp.eq.s32.totalorder %v658_v58, %v138_v9  ;;  %s521_s21 = smov [#allocation12]  }
  0x5d   :  { %v129_v8 = vsel %vm128_vm4, %v607_v17, 0.0  ;;  %v140_v11 = vsel %vm139_vm5, %v611_v20, 0.0  ;;  %v149_v12 = vstv %s364_s9  ;;  %v160_v15 = vstv %s366_s10  ;;  %s309_s22 = sshll.u32 %s521_s21, 4  ;;  %s310_s22 = int_to_ptr.vmem [resolvable:$true] %s309_s22 }
  0x5e   :  { %v119_v7 = vadd.f32 %v118_v4, %v108_v3  ;;  %vm150_vm6 = vcmp.eq.s32.totalorder %v658_v58, %v149_v12  ;;  %vm161_vm7 = vcmp.eq.s32.totalorder %v658_v58, %v160_v15  ;;  %v171_v18 = vstv %s368_s13  ;;  %s471_s23 = scalar_lea.vmem %s310_s22, 256  ;;  %p476_p13 = scmp.lt.s32.totalorder %s310_s22, %s310_s22 }
  0x5f   :  { %v151_v14 = vsel %vm150_vm6, %v617_v23, 0.0  ;;  %v162_v17 = vsel %vm161_vm7, %v619_v24, 0.0  ;;  %vm172_vm8 = vcmp.eq.s32.totalorder %v658_v58, %v171_v18  ;;  %v182_v21 = vstv %s370_s14  ;;  %p472_p12 = scmp.ne.s32.totalorder %s310_s22, %s471_s23  ;;  %p477_p0 = scmp.lt.s32.totalorder %s471_s23, %s471_s23 }
  0x60   :  { %v130_v10 = vadd.f32 %v129_v8, %v119_v7  ;;  %v173_v20 = vsel %vm172_vm8, %v623_v26, 0.0  ;;  %vm183_vm9 = vcmp.eq.s32.totalorder %v658_v58, %v182_v21  ;;  %v193_v25 = vstv %s372_s15 }
  0x61   :  { %v184_v23 = vsel %vm183_vm9, %v630_v36, 0.0  ;;  %vm194_vm10 = vcmp.eq.s32.totalorder %v658_v58, %v193_v25  ;;  %v204_v28 = vstv %s374_s16  ;;  %v215_v30 = vstv %s376_s17  ;;  %p478_p1 = por %p477_p0, %p476_p13 }
  0x62   :  { %v141_v13 = vadd.f32 %v140_v11, %v130_v10  ;;  %v195_v24 = vsel %vm194_vm10, %v632_v37, 0.0  ;;  %vm205_vm11 = vcmp.eq.s32.totalorder %v658_v58, %v204_v28  ;;  %vm216_vm12 = vcmp.eq.s32.totalorder %v658_v58, %v215_v30 }
  0x63   :  { %v253_v49 = vld [vmem:[#allocation12 + $0x8] sm:$0xff]  ;;  %v206_v26 = vsel %vm205_vm11, %v634_v41, 0.0  ;;  %v217_v32 = vsel %vm216_vm12, %v636_v42, 0.0  ;;  %v226_v33 = vstv %s378_s18  ;;  %v237_v36 = vstv %s380_s19  ;;  %p479_p2 = pnand %p478_p1, %p472_p12 }
  0x64   :  { %256 = vmax.xlane.f32.xlu0 %v253_v49  ;;  %v152_v16 = vadd.f32 %v151_v14, %v141_v13  ;;  %vm227_vm13 = vcmp.eq.s32.totalorder %v658_v58, %v226_v33  ;;  %vm238_vm14 = vcmp.eq.s32.totalorder %v658_v58, %v237_v36  ;;  %v248_v39 = vstv %s382_s20 }
  0x65   :  { %v228_v35 = vsel %vm227_vm13, %v640_v45, 0.0  ;;  %v239_v38 = vsel %vm238_vm14, %v642_v46, 0.0  ;;  %vm249_vm15 = vcmp.eq.s32.totalorder %v658_v58, %v248_v39  ;;  %vm285_vm1 = vcmask 7168  }
  0x66   :  { %v163_v19 = vadd.f32 %v162_v17, %v152_v16  ;;  %v250_v41 = vsel %vm249_vm15, %v647_v48, 0.0 }
  0x68   :  { %v174_v22 = vadd.f32 %v173_v20, %v163_v19 }
  0x6a   :  { %v185_v27 = vadd.f32 %v184_v23, %v174_v22 }
  0x6c   :  { %v196_v29 = vadd.f32 %v195_v24, %v185_v27 }
  0x6e   :  { %v207_v31 = vadd.f32 %v206_v26, %v196_v29 }
  0x70   :  { %v218_v34 = vadd.f32 %v217_v32, %v207_v31 }
  0x72   :  { %v229_v37 = vadd.f32 %v228_v35, %v218_v34 }
  0xe9   :  { %v652_v50 = vpop.xlane.xlu0 %254 }
  0xea   :  { %v258_v51 = vsub.f32 %v252_v40, %v652_v50  ;;  %v240_v40 = vadd.f32 %v239_v38, %v229_v37 }
  0xec   :  { %v260_v52 = vmul.f32 1.442695, %v258_v51  ;;  %v251_v43 = vadd.f32 %v250_v41, %v240_v40 }
  0xee   :  { %395 = vpow2.f32 %v260_v52  ;;  %v275_v42 = vsel %vm274_vm0, %v251_v43, 0.0 }
  0xef   :  { %276 = vadd.xlane.f32.xlu0 %v275_v42 }
  0xf1   :  { %v655_v53 = vpop.xlane.xlu0 %256 }
  0xf2   :  { %v259_v54 = vsub.f32 %v253_v49, %v655_v53 }
  0xf4   :  { %v262_v55 = vmul.f32 1.442695, %v259_v54 }
  0xf6   :  { %397 = vpow2.f32 %v262_v55 }
  0xf8   :  { %v396_v56 = vpop.eup %395 }
  0xf9   :  { %264 = vadd.xlane.f32.xlu1 %v396_v56 }
 0x100   :  { %v398_v6 = vpop.eup %397 }
 0x101   :  { %266 = vadd.xlane.f32.xlu1 %v398_v6 }
 0x17c   :  { %v277_v57 = vpop.xlane.xlu0 %276 }
 0x17d   :  { %v278_v58 = vrot.slane %v277_v57, 4 }
 0x17f   :  { %v279_v59 = vadd.f32 %v278_v58, %v277_v57 }
 0x181   :  { %v280_v60 = vrot.slane %v279_v59, 2 }
 0x183   :  { %v281_v61 = vadd.f32 %v280_v60, %v279_v59 }
 0x185   :  { %v282_v62 = vrot.slane %v281_v61, 1 }
 0x186   :  { %v265_v44 = vpop.xlane.xlu1 %264 }
 0x187   :  { %399 = vlog2.f32 %v265_v44  ;;  %v283_v63 = vadd.f32 %v282_v62, %v281_v61 }
 0x189   :  { %383 = vpush %v283_v63 }
 0x18e   :  { %v267_v47 = vpop.xlane.xlu1 %266 }
 0x18f   :  { %401 = vlog2.f32 %v267_v47 }
 0x191   :  { %v400_v45 = vpop.eup %399 }
 0x192   :  { %v269_v49 = vmul.f32 0.6931472, %v400_v45 }
 0x194   :  { %v272_v46 = vadd.f32 %v269_v49, %v652_v50 }
 0x196   :  { %v286_v55 = vsel %vm285_vm1, %v272_v46, 0.0 }
 0x199   :  { %v402_v51 = vpop.eup %401 }
 0x19a   :  { %v271_v52 = vmul.f32 0.6931472, %v402_v51 }
 0x19c   :  { %v273_v54 = vadd.f32 %v271_v52, %v655_v53 }
 0x19e   :  { %v287_v56 = vsel %vm285_vm1, %v273_v54, 0.0 }
 0x19f   :  { %v288_v48 = vadd.f32 %v287_v56, %v286_v55 }
 0x1a1   :  { %289 = vadd.xlane.f32.xlu1 %v288_v48 }
 0x1a2   :  { %482 = shalt.err (!%p479_p2)
}
 0x1a3   :  { %s483_s25 = scalar_lea.hbm %s725_s4, 256 }
 0x1a4   :  { %p484_p3 = scmp.ne.s32.totalorder %s725_s4, %s483_s25  ;;  %p487_p4 = scmp.lt.u32.totalorder %s483_s25, %s725_s4 }
 0x1a6   :  { %p489_p5 = pnand %p487_p4, %p484_p3 }
 0x1a8   :  { %492 = shalt.err (!%p489_p5)
}
 0x1a9   :  { %315 = dma.vmem_to_hbm [thread:$0]  %s310_s22, 256, %s725_s4, [#allocation4], %s518_s11, %s518_s11, %s519_s12  }
 0x1aa   :  { %s493_s10 = scalar_lea.hbm %s726_s5, 16 }
 0x1ab   :  { %p494_p6 = scmp.ne.s32.totalorder %s726_s5, %s493_s10  ;;  %p497_p7 = scmp.lt.u32.totalorder %s493_s10, %s726_s5 }
 0x1ad   :  { %p499_p8 = pnand %p497_p7, %p494_p6 }
 0x1ba   :  { %s384_s30 = spop %383 }
 0x22e   :  { %v290_v50 = vpop.xlane.xlu1 %289 }
 0x22f   :  { %v291_v53 = vrot.slane %v290_v50, 4 }
 0x231   :  { %v292_v0 = vadd.f32 %v291_v53, %v290_v50 }
 0x233   :  { %v293_v1 = vrot.slane %v292_v0, 2 }
 0x235   :  { %v294_v2 = vadd.f32 %v293_v1, %v292_v0 }
 0x237   :  { %v295_v3 = vrot.slane %v294_v2, 1 }
 0x239   :  { %v296_v4 = vadd.f32 %v295_v3, %v294_v2 }
 0x23b   :  { %385 = vpush %v296_v4 }
 0x26c   :  { %s386_s3 = spop %385 }
 0x26d   :  { %s298_s6 = ssub.f32 %s386_s3, %s384_s30 }
 0x26f   :  { %s301_s7 = smul.f32 0.0625, %s298_s6 }
 0x271   :  { %303 = sst [smem:[#allocation13]] %s301_s7 }
 0x272   :  { %502 = shalt.err (!%p499_p8)
}
 0x273   :  { %s522_s12 = smov [#allocation13]  }
 0x274   :  { %323 = dma.smem_to_hbm %s522_s12, 16, %s726_s5, [#allocation5]  }
 0x275   :  { %511 = dma.done.wait [#allocation4], 256  }
 0x276   :  { %512 = vsyncadd [#allocation4], 4294967040 }
 0x277   :  { %513 = dma.done.wait [#allocation5], 16  }
 0x278   :  { %514 = vsyncadd [#allocation5], 4294967280 }
 0x279   :  { %330 = sfence }
 0x27a   :  { %331 = vsyncpa [#allocation3], 1 }
 0x27b   :  { %332 = vsyncpa [#allocation11], 1 }
 0x27c   :  { %333 = vsyncpa [#allocation4], 1 }
 0x27d   :  { %334 = vsyncpa [#allocation5], 1 }
 0x27e   :  { %335 = vsyncpa [#allocation6], 1 }
 0x27f   :  { %336 = vsyncpa [#allocation8], 1 }

</bundles_post_ra>
